<compile_context>
chip_gen: v5e
topology: v5e:2x2
jax: 0.10.0
libtpu: 0.0.40
codegen_flags: <defaults>
</compile_context>

<pallas_src>
import jax
import jax.numpy as jnp
from jax.experimental import pallas as pl
from jax.experimental.pallas import tpu as pltpu

SUBLANE = 8


def _round_up(x, m):
    return ((x + m - 1) // m) * m


def _detect_num_tensorcores():
    """Best-effort: 2 TensorCores per chip on v7x, 1 on v5e/v6e."""
    try:
        kind = (getattr(jax.devices()[0], "device_kind", "") or "").lower()
    except Exception:
        return 1
    return 2 if ("v7" in kind or "7x" in kind or "7p" in kind) else 1


def qnetwork_kernel(x_ref, w1_ref, b1_ref, w2_ref, b2_ref, w3_ref, b3_ref, o_ref):
    """Fused MLP tile: relu(x@W1+b1) -> relu(.@W2+b2) -> .@W3+b3.

    Matmul inputs may be bf16 (or f32); accumulation, bias add and ReLU are f32.
    Weights/biases are VMEM-resident across the batch grid (constant index_map).
    """
    x = x_ref[...]

    h1 = jnp.dot(x, w1_ref[...], preferred_element_type=jnp.float32) + b1_ref[...]
    h1 = jnp.maximum(h1, 0.0)

    h2 = jnp.dot(h1.astype(w2_ref.dtype), w2_ref[...],
                 preferred_element_type=jnp.float32) + b2_ref[...]
    h2 = jnp.maximum(h2, 0.0)

    out = jnp.dot(h2.astype(w3_ref.dtype), w3_ref[...],
                  preferred_element_type=jnp.float32) + b3_ref[...]
    o_ref[...] = out.astype(o_ref.dtype)


def prepare_params(params, compute_dtype=jnp.bfloat16):
    """One-time param prep (hoisted out of the per-call forward path).

    Casts weights to the MXU compute dtype (default bf16) and biases to f32
    (1, out) rows.  Refresh once per optimizer step, not per forward call.
    """
    cd = jnp.dtype(compute_dtype)
    prep = {}
    for name in ("w1", "w2", "w3"):
        prep[name] = params[name].astype(cd)
    for name in ("b1", "b2", "b3"):
        prep[name] = params[name].astype(jnp.float32).reshape(1, -1)
    return prep


def qnetwork_forward(state, prepared, *, tm=2048, num_cores=None):
    """state: (B, state_size).  prepared: output of prepare_params().

    Returns (B, action_size) float32 Q-values.
    """
    w1, b1 = prepared["w1"], prepared["b1"]
    w2, b2 = prepared["w2"], prepared["b2"]
    w3, b3 = prepared["w3"], prepared["b3"]
    cd = w1.dtype

    B, S = state.shape
    F1 = w1.shape[1]
    F2 = w2.shape[1]
    A = w3.shape[1]

    if num_cores is None:
        num_cores = _detect_num_tensorcores()

    # Batch tiling: as few / as big tiles as possible (per-step overhead and
    # DMA granularity dominate this mem-bound kernel), but keep at least
    # `num_cores` evenly-split grid steps so the "parallel" axis shards across
    # both TensorCores on v7x.  Partial last tile allowed (grid = cdiv), so the
    # batch is only padded to a multiple of 8 sublanes.
    B_pad = _round_up(B, SUBLANE)
    tm_eff = min(_round_up(tm, SUBLANE), B_pad)
    if num_cores > 1 and B_pad >= num_cores * SUBLANE:
        per_core = _round_up(pl.cdiv(B_pad, num_cores), SUBLANE)
        tm_eff = min(tm_eff, per_core)
    grid_steps = pl.cdiv(B_pad, tm_eff)
    if num_cores > 1 and B_pad >= num_cores * SUBLANE and grid_steps % num_cores:
        grid_steps_even = _round_up(grid_steps, num_cores)
        tm_eff = _round_up(pl.cdiv(B_pad, grid_steps_even), SUBLANE)
        grid_steps = pl.cdiv(B_pad, tm_eff)

    # Only per-call input prep: one cast (+ one pad when B isn't a multiple of 8).
    x_p = state.astype(cd)
    if B_pad != B:
        x_p = jnp.pad(x_p, ((0, B_pad - B), (0, 0)))

    # Weights / biases: same block every grid step -> fetched once, stay in VMEM.
    resident = lambda arr: pl.BlockSpec(arr.shape, lambda i: (0,) * arr.ndim)

    itemsize = jnp.dtype(cd).itemsize
    cost = pl.CostEstimate(
        flops=2 * B_pad * (S * F1 + F1 * F2 + F2 * A),
        transcendentals=0,
        bytes_accessed=(B_pad * S + S * F1 + F1 * F2 + F2 * A) * itemsize
        + (F1 + F2 + A) * 4          # biases (f32)
        + B_pad * A * 4,             # output (f32, unpadded lanes)
    )

    out = pl.pallas_call(
        qnetwork_kernel,
        out_shape=jax.ShapeDtypeStruct((B_pad, A), jnp.float32),
        grid=(grid_steps,),
        in_specs=[
            pl.BlockSpec((tm_eff, S), lambda i: (i, 0)),
            resident(w1), resident(b1),
            resident(w2), resident(b2),
            resident(w3), resident(b3),
        ],
        out_specs=pl.BlockSpec((tm_eff, A), lambda i: (i, 0)),
        compiler_params=pltpu.CompilerParams(
            dimension_semantics=("parallel",)),   # v7x: shard batch across 2 TCs
        cost_estimate=cost,
    )(x_p, w1, b1, w2, b2, w3, b3)

    # Strip the (at most 7 rows of) batch padding.
    return out if B_pad == B else out[:B]


def init_params(key, state_size, action_size, fc1_units=64, fc2_units=64):
    """Deterministic init mimicking PyTorch nn.Linear default (uniform +-1/sqrt(fan_in))."""
    ks = jax.random.split(key, 6)

    def linear(kw, kb, fan_in, fan_out):
        bound = 1.0 / jnp.sqrt(jnp.float32(fan_in))
        w = jax.random.uniform(kw, (fan_in, fan_out), jnp.float32, -bound, bound)
        b = jax.random.uniform(kb, (1, fan_out), jnp.float32, -bound, bound)
        return w, b

    w1, b1 = linear(ks[0], ks[1], state_size, fc1_units)
    w2, b2 = linear(ks[2], ks[3], fc1_units, fc2_units)
    w3, b3 = linear(ks[4], ks[5], fc2_units, action_size)
    return {"w1": w1, "b1": b1, "w2": w2, "b2": b2, "w3": w3, "b3": b3}


def qnetwork_ref(state, params, compute_dtype=jnp.float32):
    """Pure-JAX reference mirroring the kernel's precision policy.

    For f32 this is the exact PyTorch forward; for bf16 the matmul inputs are
    rounded to bf16 (as the kernel feeds the MXU) while all other math is f32.
    """
    q = lambda a: a.astype(compute_dtype).astype(jnp.float32)
    h1 = jnp.maximum(q(state) @ q(params["w1"]) + params["b1"], 0.0)
    h2 = jnp.maximum(q(h1) @ q(params["w2"]) + params["b2"], 0.0)
    return q(h2) @ q(params["w3"]) + params["b3"]


if __name__ == "__main__":
    # Banana-Collector sizes: state_size=37, action_size=4.
    STATE_SIZE, ACTION_SIZE = 37, 4

    key = jax.random.PRNGKey(0)
    k_params, k_small, k_big, k_odd = jax.random.split(key, 4)
    params = init_params(k_params, STATE_SIZE, ACTION_SIZE)

    # Param prep hoisted out of the forward path (done once here).
    prep_f32 = prepare_params(params, jnp.float32)
    prep_bf16 = prepare_params(params, jnp.bfloat16)

    fwd = jax.jit(qnetwork_forward, static_argnames=("tm", "num_cores"))

    # 1) Tiny batch (B=2), f32: exact-semantics check vs. the PyTorch forward.
    state_small = jax.random.normal(k_small, (2, STATE_SIZE), jnp.float32)
    out_small = jax.block_until_ready(fwd(state_small, prep_f32, tm=2048))
    ref_small = qnetwork_ref(state_small, params, jnp.float32)
    assert out_small.shape == (2, ACTION_SIZE)
    assert jnp.allclose(out_small, ref_small, atol=1e-5, rtol=1e-5), "f32 mismatch"

    # 2) Larger batch (B=512), bf16 compute: big-tile path (1 step on v5e/v6e,
    #    2 parallel steps on v7x).
    state_big = jax.random.normal(k_big, (512, STATE_SIZE), jnp.float32)
    out_big = jax.block_until_ready(fwd(state_big, prep_bf16, tm=2048))
    ref_big = qnetwork_ref(state_big, params, jnp.bfloat16)
    assert out_big.shape == (512, ACTION_SIZE)
    assert jnp.allclose(out_big, ref_big, atol=1e-2, rtol=1e-2), "bf16 mismatch"

    # 3) Batch not a multiple of the tile (B=300, tm=256): exercises the
    #    partial-last-tile grid (pl.cdiv) and the trailing [:B] slice.
    state_odd = jax.random.normal(k_odd, (300, STATE_SIZE), jnp.float32)
    out_odd = jax.block_until_ready(fwd(state_odd, prep_bf16, tm=256))
    ref_odd = qnetwork_ref(state_odd, params, jnp.bfloat16)
    assert out_odd.shape == (300, ACTION_SIZE)
    assert jnp.allclose(out_odd, ref_odd, atol=1e-2, rtol=1e-2), "partial-tile mismatch"

    print("KERNEL_OK")
</pallas_src>

<mosaic_0001>
module attributes {stable_mosaic.version = 11 : i64} {
  func.func @qnetwork_kernel(%arg0: i32, %arg1: memref<8x37xf32, #tpu.memory_space<vmem>>, %arg2: memref<37x64xf32, #tpu.memory_space<vmem>>, %arg3: memref<1x64xf32, #tpu.memory_space<vmem>>, %arg4: memref<64x64xf32, #tpu.memory_space<vmem>>, %arg5: memref<1x64xf32, #tpu.memory_space<vmem>>, %arg6: memref<64x4xf32, #tpu.memory_space<vmem>>, %arg7: memref<1x4xf32, #tpu.memory_space<vmem>>, %arg8: memref<8x4xf32, #tpu.memory_space<vmem>>) attributes {dimension_semantics = [#tpu.dimension_semantics<parallel>], iteration_bounds = array<i64: 1>, scalar_prefetch = 0 : i64, scratch_operands = 0 : i64, tpu.core_type = #tpu.core_type<tc>, window_params = [{transform_indices = @transform_0, window_bounds = array<i64: 8, 37>}, {pipeline_mode = #tpu.pipeline_mode<synchronous>, transform_indices = @transform_1, window_bounds = array<i64: 37, 64>}, {pipeline_mode = #tpu.pipeline_mode<synchronous>, transform_indices = @transform_2, window_bounds = array<i64: 1, 64>}, {pipeline_mode = #tpu.pipeline_mode<synchronous>, transform_indices = @transform_3, window_bounds = array<i64: 64, 64>}, {pipeline_mode = #tpu.pipeline_mode<synchronous>, transform_indices = @transform_4, window_bounds = array<i64: 1, 64>}, {pipeline_mode = #tpu.pipeline_mode<synchronous>, transform_indices = @transform_5, window_bounds = array<i64: 64, 4>}, {pipeline_mode = #tpu.pipeline_mode<synchronous>, transform_indices = @transform_6, window_bounds = array<i64: 1, 4>}, {transform_indices = @transform_7, window_bounds = array<i64: 8, 4>}]} {
    %c0 = arith.constant 0 : index
    %c0_0 = arith.constant 0 : index
    %0 = vector.load %arg1[%c0, %c0_0] : memref<8x37xf32, #tpu.memory_space<vmem>>, vector<8x37xf32>
    %c0_1 = arith.constant 0 : index
    %c0_2 = arith.constant 0 : index
    %1 = vector.load %arg2[%c0_1, %c0_2] : memref<37x64xf32, #tpu.memory_space<vmem>>, vector<37x64xf32>
    %cst = arith.constant dense<0.000000e+00> : vector<8x64xf32>
    %2 = tpu.matmul %0, %1, %cst {dimension_numbers = #tpu.dot_dimension_numbers<[1], [0], [0], [1], [0, 0, 1, 1], [], []>} : vector<8x37xf32>, vector<37x64xf32>, vector<8x64xf32> -> vector<8x64xf32>
    %c0_3 = arith.constant 0 : index
    %c0_4 = arith.constant 0 : index
    %3 = vector.load %arg3[%c0_3, %c0_4] : memref<1x64xf32, #tpu.memory_space<vmem>>, vector<1x64xf32>
    %4 = vector.broadcast %3 : vector<1x64xf32> to vector<8x64xf32>
    %5 = arith.addf %2, %4 : vector<8x64xf32>
    %cst_5 = arith.constant 0.000000e+00 : f32
    %6 = vector.broadcast %cst_5 : f32 to vector<8x64xf32>
    %7 = arith.maximumf %5, %6 : vector<8x64xf32>
    %c0_6 = arith.constant 0 : index
    %c0_7 = arith.constant 0 : index
    %8 = vector.load %arg4[%c0_6, %c0_7] : memref<64x64xf32, #tpu.memory_space<vmem>>, vector<64x64xf32>
    %cst_8 = arith.constant dense<0.000000e+00> : vector<8x64xf32>
    %9 = tpu.matmul %7, %8, %cst_8 {dimension_numbers = #tpu.dot_dimension_numbers<[1], [0], [0], [1], [0, 0, 1, 1], [], []>} : vector<8x64xf32>, vector<64x64xf32>, vector<8x64xf32> -> vector<8x64xf32>
    %c0_9 = arith.constant 0 : index
    %c0_10 = arith.constant 0 : index
    %10 = vector.load %arg5[%c0_9, %c0_10] : memref<1x64xf32, #tpu.memory_space<vmem>>, vector<1x64xf32>
    %11 = vector.broadcast %10 : vector<1x64xf32> to vector<8x64xf32>
    %12 = arith.addf %9, %11 : vector<8x64xf32>
    %cst_11 = arith.constant 0.000000e+00 : f32
    %13 = vector.broadcast %cst_11 : f32 to vector<8x64xf32>
    %14 = arith.maximumf %12, %13 : vector<8x64xf32>
    %c0_12 = arith.constant 0 : index
    %c0_13 = arith.constant 0 : index
    %15 = vector.load %arg6[%c0_12, %c0_13] : memref<64x4xf32, #tpu.memory_space<vmem>>, vector<64x4xf32>
    %cst_14 = arith.constant dense<0.000000e+00> : vector<8x4xf32>
    %16 = tpu.matmul %14, %15, %cst_14 {dimension_numbers = #tpu.dot_dimension_numbers<[1], [0], [0], [1], [0, 0, 1, 1], [], []>} : vector<8x64xf32>, vector<64x4xf32>, vector<8x4xf32> -> vector<8x4xf32>
    %c0_15 = arith.constant 0 : index
    %c0_16 = arith.constant 0 : index
    %17 = vector.load %arg7[%c0_15, %c0_16] : memref<1x4xf32, #tpu.memory_space<vmem>>, vector<1x4xf32>
    %18 = vector.broadcast %17 : vector<1x4xf32> to vector<8x4xf32>
    %19 = arith.addf %16, %18 : vector<8x4xf32>
    %c0_17 = arith.constant 0 : index
    %c0_18 = arith.constant 0 : index
    %20 = vector.load %arg8[%c0_17, %c0_18] : memref<8x4xf32, #tpu.memory_space<vmem>>, vector<8x4xf32>
    tpu.vector_store %arg8[%c0_17, %c0_18], %19 {strides = array<i32>} : memref<8x4xf32, #tpu.memory_space<vmem>>, vector<8x4xf32>,
    return
  }
  func.func @transform_0(%arg0: i32) -> (i32, i32) {
    %c0_i32 = arith.constant 0 : i32
    %c0_i32_0 = arith.constant 0 : i32
    return %arg0, %c0_i32 : i32, i32
  }
  func.func @transform_1(%arg0: i32) -> (i32, i32) {
    %c0_i32 = arith.constant 0 : i32
    %c0_i32_0 = arith.constant 0 : i32
    %c0_i32_1 = arith.constant 0 : i32
    return %c0_i32, %c0_i32_0 : i32, i32
  }
  func.func @transform_2(%arg0: i32) -> (i32, i32) {
    %c0_i32 = arith.constant 0 : i32
    %c0_i32_0 = arith.constant 0 : i32
    %c0_i32_1 = arith.constant 0 : i32
    return %c0_i32, %c0_i32_0 : i32, i32
  }
  func.func @transform_3(%arg0: i32) -> (i32, i32) {
    %c0_i32 = arith.constant 0 : i32
    %c0_i32_0 = arith.constant 0 : i32
    %c0_i32_1 = arith.constant 0 : i32
    return %c0_i32, %c0_i32_0 : i32, i32
  }
  func.func @transform_4(%arg0: i32) -> (i32, i32) {
    %c0_i32 = arith.constant 0 : i32
    %c0_i32_0 = arith.constant 0 : i32
    %c0_i32_1 = arith.constant 0 : i32
    return %c0_i32, %c0_i32_0 : i32, i32
  }
  func.func @transform_5(%arg0: i32) -> (i32, i32) {
    %c0_i32 = arith.constant 0 : i32
    %c0_i32_0 = arith.constant 0 : i32
    %c0_i32_1 = arith.constant 0 : i32
    return %c0_i32, %c0_i32_0 : i32, i32
  }
  func.func @transform_6(%arg0: i32) -> (i32, i32) {
    %c0_i32 = arith.constant 0 : i32
    %c0_i32_0 = arith.constant 0 : i32
    %c0_i32_1 = arith.constant 0 : i32
    return %c0_i32, %c0_i32_0 : i32, i32
  }
  func.func @transform_7(%arg0: i32) -> (i32, i32) {
    %c0_i32 = arith.constant 0 : i32
    %c0_i32_0 = arith.constant 0 : i32
    return %arg0, %c0_i32 : i32, i32
  }
}

</mosaic_0001>

<bundles_post_ra>
// kernel: qnetwork_forward.1
= control target key start
LH: loop header
LB: loop body
LE: loop exit
PB: predicated region body
PF: predicated region fallthrough
CT: control target
= control target key end

     0   :  { %12 = vsyncpa [#allocation3], 0  ;;  %s196_s27 = smov [#allocation2]   ;;  %s197_s29 = smov 128   ;;  %s305_s0 = inlined_call_operand.vmem [shape: f32[8,37], index: 0, kind: input, shape index: {}]   ;;  %s306_s1 = inlined_call_operand.hbm [shape: f32[37,64], index: 1, kind: input, shape index: {}]   ;;  %s307_s2 = inlined_call_operand.vmem [shape: f32[1,64], index: 2, kind: input, shape index: {}]   ;;  %s308_s3 = inlined_call_operand.vmem [shape: f32[64,64], index: 3, kind: input, shape index: {}]   ;;  %s309_s4 = inlined_call_operand.vmem [shape: f32[1,64], index: 4, kind: input, shape index: {}]   ;;  %s310_s5 = inlined_call_operand.vmem [shape: f32[64,4], index: 5, kind: input, shape index: {}]   ;;  %s311_s6 = inlined_call_operand.vmem [shape: f32[1,4], index: 6, kind: input, shape index: {}]   ;;  %s312_s7 = inlined_call_operand.vmem [shape: f32[8,4], index: 7, kind: output, shape index: {}]  }
   0x1   :  { %s19_s26 = sshll.u32 %s306_s1, 4  ;;  %s21_s28 = sshll.u32 %s196_s27, 4  ;;  %s20_s26 = int_to_ptr.hbm [resolvable:$true] %s19_s26  ;;  %s22_s28 = int_to_ptr.vmem [resolvable:$true] %s21_s28 }
   0x2   :  { %s198_s30 = smov 8  }
   0x3   :  { %27 = dma.hbm_to_vmem [thread:$0]  %s20_s26, 640, %s22_s28, [#allocation3], %s197_s29, %s197_s29, %s198_s30  }
   0x4   :  { %194 = dma.done.wait [#allocation3], 640  }
   0x5   :  { %195 = vsyncadd [#allocation3], 4294966656  ;;  %vm56_vm0 = vcmask 1044480   ;;  %v47_v0 = vld [vmem:[#allocation2 + $0x20] sm:$0x1f]  ;;  %v46_v1 = vld [vmem:[#allocation2 + $0x18] sm:$0xff] }
   0x6   :  { %160 = vmatpush.msk.msra.mxu0 %vm56_vm0, %v47_v0  ;;  %v45_v2 = vld [vmem:[#allocation2 + $0x10] sm:$0xff]  ;;  %v88_v3 = vld [vmem:[%s308_s3 + $0x38] sm:$0xff]  ;;  %v44_v5 = vld [vmem:[#allocation2 + $0x8] sm:$0xff]  ;;  %vm52_vm1 = vcmask 302080   ;;  %vm93_vm2 = vcmask 523264   ;;  %vm153_vm3 = vcmask 31744  }
   0x7   :  { %v87_v4 = vld [vmem:[%s308_s3 + $0x30] sm:$0xff]  ;;  %105 = vmatpush.msra.mxu1 %v88_v3  ;;  %v86_v6 = vld [vmem:[%s308_s3 + $0x28] sm:$0xff]  ;;  %v43_v7 = vld [vmem:[#allocation2] sm:$0xff] }
   0x8   :  { %72 = vmatpush.msra.mxu0 %v46_v1  ;;  %v85_v8 = vld [vmem:[%s308_s3 + $0x20] sm:$0xff]  ;;  %v84_v10 = vld [vmem:[%s308_s3 + $0x18] sm:$0xff]  ;;  %v83_v11 = vld [vmem:[%s308_s3 + $0x10] sm:$0xff] }
   0x9   :  { %106 = vmatpush.msra.mxu1 %v87_v4  ;;  %v42_v9 = vld [vmem:[%s305_s0] sm:$0xff]  ;;  %v82_v12 = vld [vmem:[%s308_s3 + $0x8] sm:$0xff]  ;;  %v125_v14 = vld [vmem:[%s310_s5 + $0x38] sm:$0xff] }
   0xa   :  { %73 = vmatpush.msra.mxu0 %v45_v2  ;;  %v81_v13 = vld [vmem:[%s308_s3] sm:$0xff]  ;;  %v124_v15 = vld [vmem:[%s310_s5 + $0x30] sm:$0xff]  ;;  %141 = vmatpush.msra.mxu2 %v125_v14  ;;  %v123_v16 = vld [vmem:[%s310_s5 + $0x28] sm:$0xff] }
   0xb   :  { %107 = vmatpush.msra.mxu1 %v86_v6  ;;  %v122_v17 = vld [vmem:[%s310_s5 + $0x20] sm:$0xff]  ;;  %v121_v18 = vld [vmem:[%s310_s5 + $0x18] sm:$0xff]  ;;  %v120_v23 = vld [vmem:[%s310_s5 + $0x10] sm:$0xff] }
   0xc   :  { %74 = vmatpush.msra.mxu0 %v44_v5  ;;  %142 = vmatpush.msra.mxu2 %v124_v15  ;;  %v167_v19 = vld [vmem:[%s307_s2] ss:$0 sm:$0xff]  ;;  %v119_v24 = vld [vmem:[%s310_s5 + $0x8] sm:$0xff] }
   0xd   :  { %108 = vmatpush.msra.mxu1 %v85_v8  ;;  %v118_v25 = vld [vmem:[%s310_s5] sm:$0xff] }
   0xe   :  { %75 = vmatpush.msra.mxu0 %v43_v7  ;;  %143 = vmatpush.msra.mxu2 %v123_v16  ;;  %v168_v26 = vld [vmem:[%s309_s4] ss:$0 sm:$0xff] }
   0xf   :  { %161 = vmatmul.msk.f32.vlgmr.msra.gmra.mxu0 %vm52_vm1, %v42_v9  ;;  %109 = vmatpush.msra.mxu1 %v84_v10  ;;  %v169_v30 = vld [vmem:[%s311_s6] ss:$0 sm:$0xff] }
  0x10   :  { %144 = vmatpush.msra.mxu2 %v122_v17 }
  0x11   :  { %110 = vmatpush.msra.mxu1 %v83_v11 }
  0x12   :  { %145 = vmatpush.msra.mxu2 %v121_v18 }
  0x13   :  { %111 = vmatpush.msra.mxu1 %v82_v12 }
  0x14   :  { %146 = vmatpush.msra.mxu2 %v120_v23 }
  0x15   :  { %112 = vmatpush.msra.mxu1 %v81_v13 }
  0x16   :  { %147 = vmatpush.msra.mxu2 %v119_v24 }
  0x18   :  { %148 = vmatpush.msra.mxu2 %v118_v25 }
  0x8c   :  { %v77_v20 = vpop.f32.mrf.mxu0 }
  0x8d   :  { %v78_v21 = vadd.f32 %v167_v19, %v77_v20 }
  0x8f   :  { %v80_v22 = vmax.f32 %v78_v21, 0.0 }
  0x91   :  { %162 = vmatmul.msk.f32.vlgmr.msra.gmra.mxu1 %vm93_vm2, %v80_v22 }
 0x10e   :  { %v114_v27 = vpop.f32.mrf.mxu1 }
 0x10f   :  { %v115_v28 = vadd.f32 %v168_v26, %v114_v27 }
 0x111   :  { %v117_v29 = vmax.f32 %v115_v28, 0.0 }
 0x113   :  { %163 = vmatmul.msk.f32.vlgmr.msra.gmra.mxu2 %vm93_vm2, %v117_v29 }
 0x196   :  { %v150_v31 = vpop.f32.mrf.mxu2 }
 0x197   :  { %v151_v32 = vadd.f32 %v169_v30, %v150_v31 }
 0x199   :  { %154 = vst.msk [vmem:[%s312_s7] sm:$0xff] %vm153_vm3, %v151_v32 }
 0x19a   :  { %159 = vsyncpa [#allocation3], 1 }

</bundles_post_ra>
